<compile_context>
chip_gen: v5e
topology: v5e:2x2
jax: 0.10.0
libtpu: 0.0.40
codegen_flags: <defaults>
</compile_context>

<pallas_src>
import jax
import jax.numpy as jnp
from jax.experimental import pallas as pl
from jax.experimental.pallas import tpu as pltpu

_MIB = 1024 * 1024


def _linear_kernel(x_ref, w_ref, b_ref, o_ref):
    # x_ref: (TM, F)    f32 VMEM  -- one batch tile (streamed, double-buffered)
    # w_ref: (1, F)     f32 VMEM  -- torch-layout weight row, stays resident
    # b_ref: (1, 1)     f32 SMEM  -- scalar bias
    # o_ref: (1, 1, TM) f32 VMEM  -- lane-dense output row for this tile
    acc = jax.lax.dot_general(
        w_ref[...],
        x_ref[...],
        dimension_numbers=(((1,), (1,)), ((), ())),  # contract F on both -> (1, TM)
        preferred_element_type=jnp.float32,
    )
    o_ref[0] = (acc + b_ref[0, 0]).astype(o_ref.dtype)


def _round_up(n, m):
    return ((n + m - 1) // m) * m


def _physical_vmem_bytes():
    # v5e/v6e: 128 MiB, v7x: 64 MiB.  Conservative fallback if the query is
    # unavailable (e.g. interpret mode).
    try:
        return int(pltpu.get_tpu_info().vmem_capacity_bytes)
    except Exception:
        return 64 * _MIB


def _choose_block_rows(batch, n_features, vmem_limit_bytes):
    """Pick the batch-tile height (multiple of 8, ideally 128)."""
    lane_f = _round_up(max(n_features, 1), 128)      # VMEM lane padding of x rows
    per_row = lane_f * 4 + 8 * 4                     # x row + sublane-padded out row
    reserve = 2 * _MIB                               # weight bufs + compiler scratch
    # Target ~16 MiB per x tile (double-buffered), within the scoped limit.
    tile_target = min(16 * _MIB,
                      max((vmem_limit_bytes - reserve) // 2, per_row * 8))
    rows = tile_target // per_row
    if rows >= 128:
        rows = (rows // 128) * 128
    else:
        rows = max(8, (rows // 8) * 8)               # large-F: no 128-row floor
    # v7x megacore: keep grid >= 2 when the batch allows it so both TCs work.
    rows = min(rows, max(128, _round_up(pl.cdiv(batch, 2), 128)))
    # Never taller than the (sublane-rounded) batch itself.
    rows = min(rows, _round_up(batch, 8))
    return max(rows, 8)


def linear_forward(x, weight, bias, *, block_rows=None):
    """torch.nn.Linear(F, 1) forward.

    x:      (B, F) float32
    weight: (1, F) float32   (torch layout: (out_features, in_features))
    bias:   (1,)   float32
    returns (B, 1) float32 == x @ weight.T + bias
    """
    B, F = x.shape

    phys_vmem = _physical_vmem_bytes()
    # Raise the scoped-VMEM limit explicitly (v5e default 16 MiB / v6e 32 MiB
    # are too small for the larger tiles); 3/4 of physical, capped at 64 MiB.
    vmem_limit = min((phys_vmem * 3) // 4, 64 * _MIB)

    if block_rows is not None:
        # (8,128) rule: block second-to-last dim must be a multiple of 8.
        tm = max(8, _round_up(int(block_rows), 8))
    else:
        tm = _choose_block_rows(B, F, vmem_limit)

    # Actual double-buffered footprint (lane/sublane padded); make sure the
    # scoped limit covers it (huge F or user-supplied block_rows).
    lane_f = _round_up(max(F, 1), 128)
    needed = 2 * (tm * lane_f * 4                   # x tile
                  + 8 * _round_up(tm, 128) * 4      # output row block
                  + 8 * lane_f * 4) + 2 * _MIB      # weight block + scratch
    vmem_limit = int(min(max(vmem_limit, needed), phys_vmem))
    # TODO(synk): if F is so large that even an 8-row double-buffered tile
    # exceeds physical VMEM (F >~ 1e6 on v7x), add a trailing "arbitrary"
    # F-reduction grid axis with a small VMEM f32 accumulator.

    grid_b = pl.cdiv(B, tm)
    bias2d = bias.reshape(1, 1)

    out = pl.pallas_call(
        _linear_kernel,
        out_shape=jax.ShapeDtypeStruct((grid_b, 1, tm), x.dtype),
        grid=(grid_b,),
        in_specs=[
            # x streamed per batch tile (auto double-buffered).  The last tile
            # may over-read past B; those lanes are discarded below.
            pl.BlockSpec((tm, F), lambda i: (i, 0)),
            pl.BlockSpec((1, F), lambda i: (0, 0)),             # weight: resident
            pl.BlockSpec(memory_space=pltpu.MemorySpace.SMEM),  # bias: scalar path
        ],
        out_specs=pl.BlockSpec((1, 1, tm), lambda i: (i, 0, 0)),
        compiler_params=pltpu.CompilerParams(
            dimension_semantics=("parallel",),
            vmem_limit_bytes=vmem_limit,
        ),
    )(x, weight, bias2d)

    # Lane-dense (grid_b, 1, TM) -> (B, 1) column; rows past B (ragged last
    # tile) carry undefined values and are sliced away here.
    return out.reshape(grid_b * tm)[:B].reshape(B, 1)


if __name__ == "__main__":
    n_features = 32
    batch = 8

    key = jax.random.PRNGKey(0)
    kx, kw, kb, kx2 = jax.random.split(key, 4)

    # torch.nn.Linear-style init: U(-k, k), k = 1/sqrt(F).
    bound = 1.0 / float(n_features) ** 0.5
    weight = jax.random.uniform(kw, (1, n_features), jnp.float32, -bound, bound)
    bias = jax.random.uniform(kb, (1,), jnp.float32, -bound, bound)

    x = jax.random.normal(kx, (batch, n_features), jnp.float32)

    out = jax.block_until_ready(linear_forward(x, weight, bias))
    ref = x @ weight.T + bias
    assert out.shape == (batch, 1)
    assert jnp.allclose(out, ref, atol=1e-5, rtol=1e-5)

    # Multi-tile path with a ragged last tile (B=300 not a multiple of 128),
    # no wrapper-side padding of x.
    x2 = jax.random.normal(kx2, (300, n_features), jnp.float32)
    out2 = jax.block_until_ready(linear_forward(x2, weight, bias, block_rows=128))
    ref2 = x2 @ weight.T + bias
    assert out2.shape == (300, 1)
    assert jnp.allclose(out2, ref2, atol=1e-5, rtol=1e-5)

    # User-supplied block_rows that violates the (8,128) rule is rounded up.
    out3 = jax.block_until_ready(linear_forward(x2, weight, bias, block_rows=100))
    assert out3.shape == (300, 1)
    assert jnp.allclose(out3, ref2, atol=1e-5, rtol=1e-5)

    print("KERNEL_OK")
</pallas_src>

<mosaic_0001>
module attributes {stable_mosaic.version = 11 : i64} {
  func.func @_linear_kernel(%arg0: i32, %arg1: memref<8x32xf32, #tpu.memory_space<vmem>>, %arg2: memref<1x32xf32, #tpu.memory_space<vmem>>, %arg3: memref<1x1xf32, #tpu.memory_space<smem>>, %arg4: memref<1x1x8xf32, #tpu.memory_space<vmem>>) attributes {dimension_semantics = [#tpu.dimension_semantics<parallel>], iteration_bounds = array<i64: 1>, scalar_prefetch = 0 : i64, scratch_operands = 0 : i64, tpu.core_type = #tpu.core_type<tc>, window_params = [{transform_indices = @transform_0, window_bounds = array<i64: 8, 32>}, {pipeline_mode = #tpu.pipeline_mode<synchronous>, transform_indices = @transform_1, window_bounds = array<i64: 1, 32>}, {transform_indices = @transform_2, window_bounds = array<i64: 1, 1>}, {transform_indices = @transform_3, window_bounds = array<i64: 1, 1, 8>}]} {
    %c0 = arith.constant 0 : index
    %c0_0 = arith.constant 0 : index
    %0 = vector.load %arg2[%c0, %c0_0] : memref<1x32xf32, #tpu.memory_space<vmem>>, vector<1x32xf32>
    %c0_1 = arith.constant 0 : index
    %c0_2 = arith.constant 0 : index
    %1 = vector.load %arg1[%c0_1, %c0_2] : memref<8x32xf32, #tpu.memory_space<vmem>>, vector<8x32xf32>
    %cst = arith.constant dense<0.000000e+00> : vector<1x8xf32>
    %2 = tpu.matmul %0, %1, %cst {dimension_numbers = #tpu.dot_dimension_numbers<[1], [1], [0], [0], [0, 0, 1, 0], [], []>} : vector<1x32xf32>, vector<8x32xf32>, vector<1x8xf32> -> vector<1x8xf32>
    %c0_3 = arith.constant 0 : index
    %c0_4 = arith.constant 0 : index
    %3 = memref.load %arg3[%c0_3, %c0_4] : memref<1x1xf32, #tpu.memory_space<smem>>
    %4 = vector.broadcast %3 : f32 to vector<1x8xf32>
    %5 = arith.addf %2, %4 : vector<1x8xf32>
    %c0_5 = arith.constant 0 : index
    %c0_6 = arith.constant 0 : index
    %c0_7 = arith.constant 0 : index
    %6 = vector.load %arg4[%c0_5, %c0_6, %c0_7] : memref<1x1x8xf32, #tpu.memory_space<vmem>>, vector<1x1x8xf32>
    %7 = vector.shape_cast %6 : vector<1x1x8xf32> to vector<1x8xf32>
    %8 = vector.shape_cast %5 : vector<1x8xf32> to vector<1x1x8xf32>
    tpu.vector_store %arg4[%c0_5, %c0_6, %c0_7], %8 {strides = array<i32>} : memref<1x1x8xf32, #tpu.memory_space<vmem>>, vector<1x1x8xf32>,
    return
  }
  func.func @transform_0(%arg0: i32) -> (i32, i32) {
    %c0_i32 = arith.constant 0 : i32
    %c0_i32_0 = arith.constant 0 : i32
    return %arg0, %c0_i32 : i32, i32
  }
  func.func @transform_1(%arg0: i32) -> (i32, i32) {
    %c0_i32 = arith.constant 0 : i32
    %c0_i32_0 = arith.constant 0 : i32
    %c0_i32_1 = arith.constant 0 : i32
    return %c0_i32, %c0_i32_0 : i32, i32
  }
  func.func @transform_2(%arg0: i32) -> (i32, i32) {
    %c0_i32 = arith.constant 0 : i32
    %c0_i32_0 = arith.constant 0 : i32
    %c0_i32_1 = arith.constant 0 : i32
    return %c0_i32, %c0_i32_0 : i32, i32
  }
  func.func @transform_3(%arg0: i32) -> (i32, i32, i32) {
    %c0_i32 = arith.constant 0 : i32
    %c0_i32_0 = arith.constant 0 : i32
    %c0_i32_1 = arith.constant 0 : i32
    return %arg0, %c0_i32, %c0_i32_0 : i32, i32, i32
  }
}

</mosaic_0001>

<bundles_post_ra>
// kernel: tpu_custom_call.1
= control target key start
LH: loop header
LB: loop body
LE: loop exit
PB: predicated region body
PF: predicated region fallthrough
CT: control target
= control target key end

     0   :  { %9 = vsyncpa [#allocation4], 0  ;;  %s170_s0 = inlined_call_operand.hbm [shape: f32[8,32], index: 0, kind: input, shape index: {}]   ;;  %s171_s1 = inlined_call_operand.vmem [shape: f32[1,32], index: 1, kind: input, shape index: {}]   ;;  %s172_s2 = inlined_call_operand.<no memory space> [shape: f32[1,1], index: 2, kind: input, shape index: {}]   ;;  %s173_s3 = inlined_call_operand.hbm [shape: f32[1,1,8], index: 3, kind: output, shape index: {}]  }
   0x1   :  { %10 = vsyncpa [#allocation5], 0  ;;  %s16_s14 = sshll.u32 %s170_s0, 4  ;;  %s136_s15 = smov [#allocation3]   ;;  %s17_s14 = int_to_ptr.hbm [resolvable:$true] %s16_s14 }
   0x2   :  { %s18_s16 = sshll.u32 %s136_s15, 4  ;;  %s19_s16 = int_to_ptr.vmem [resolvable:$true] %s18_s16 }
   0x3   :  { %21 = dma.hbm_to_vmem [thread:$0]  %s17_s14, 128, %s19_s16, [#allocation4]  }
   0x4   :  { %132 = dma.done.wait [#allocation4], 128  }
   0x5   :  { %133 = vsyncadd [#allocation4], 4294967168  ;;  %vm34_vm0 = vcmask 261120   ;;  %v31_v0 = vld [vmem:[#allocation3] sm:$0xff]  ;;  %v33_v2 = vstv %s172_s2  ;;  %s137_s0 = smov [#allocation6]   ;;  %s70_s24 = sshll.u32 %s173_s3, 4  ;;  %s71_s24 = int_to_ptr.hbm [resolvable:$true] %s70_s24 }
   0x6   :  { %80 = vmatpush.xpose.msk.msra.mxu0 %vm34_vm0, %v31_v0  ;;  %v30_v1 = vld [vmem:[%s171_s1] sm:$0x1]  ;;  %s68_s21 = sshll.u32 %s137_s0, 4  ;;  %vm61_vm1 = vcmask 57344   ;;  %s69_s21 = int_to_ptr.vmem [resolvable:$true] %s68_s21 }
   0x9   :  { %81 = vmatmul.msk.f32.vlgmr.msra.gmra.mxu0 %vm34_vm0, %v30_v1 }
  0x86   :  { %v58_v3 = vpop.f32.mrf.mxu0 }
  0x87   :  { %v59_v4 = vadd.f32 %v58_v3, %v33_v2 }
  0x89   :  { %62 = vst.msk [vmem:[#allocation6] sm:$0x1] %vm61_vm1, %v59_v4 }
  0x8a   :  { %73 = dma.vmem_to_hbm [thread:$0]  %s69_s21, 16, %s71_s24, [#allocation5]  }
  0x8b   :  { %134 = dma.done.wait [#allocation5], 16  }
  0x8c   :  { %135 = vsyncadd [#allocation5], 4294967280 }
  0x8d   :  { %78 = vsyncpa [#allocation4], 1 }
  0x8e   :  { %79 = vsyncpa [#allocation5], 1 }

</bundles_post_ra>
